<compile_context>
chip_gen: v7x
topology: tpu7x:2x2x1
jax: 0.10.0
libtpu: 0.0.40
codegen_flags: <defaults>
</compile_context>

<pallas_src>
import jax
import jax.numpy as jnp
from jax.experimental import pallas as pl
from jax.experimental.pallas import tpu as pltpu

_LANE = 128
# Target total pipeline-buffer footprint (2 inputs + 1 output, double
# buffered).  12 MiB fits every generation's *default* scoped VMEM limit
# (v5e: 16 MiB, v6e: 32 MiB, v7x: 32 MiB) so no vmem_limit_bytes override is
# needed, and it respects the <=24 MiB buffering cap advised for v7x.
_VMEM_BUFFER_BUDGET = 12 * 1024 * 1024
_MAX_TB = 8192


def _choose_tile(B, D, elem_bytes):
    """Pick (TB, B_pad): TB a multiple of 128, B_pad = grid_steps * TB >= B."""
    d_lanes = pl.cdiv(D, _LANE) * _LANE                    # lane-padded row width in VMEM
    # 2 inputs (d_lanes wide) + 1 f32 output (1 lane, padded to 128), each
    # double-buffered by the Pallas pipeline.
    bytes_per_row = 2 * 2 * d_lanes * elem_bytes + 2 * _LANE * 4
    tb_cap = _VMEM_BUFFER_BUDGET // bytes_per_row
    tb_cap = max((tb_cap // _LANE) * _LANE, _LANE)
    tb_cap = min(tb_cap, _MAX_TB)

    b128 = pl.cdiv(B, _LANE) * _LANE
    if b128 <= tb_cap:
        if b128 >= 512:
            # Moderate batch: force >= 2 grid steps so the "parallel" batch
            # axis can use both TensorCores on v7x.
            tb = pl.cdiv(pl.cdiv(B, 2), _LANE) * _LANE
            steps = 2
        else:
            tb = b128
            steps = 1
    else:
        tb = tb_cap
        steps = pl.cdiv(B, tb)
    return tb, steps * tb


def _mf_score_kernel(u_ref, i_ref, o_ref):
    """One grid step = one (TB, D) row tile of TB batch elements.

    u_ref, i_ref : (TB, D) embedding tiles (rows = batch, lanes = features).
    o_ref        : (TB, 1) per-row preference scores (f32).
    """
    u = u_ref[...]
    v = i_ref[...]
    if u.dtype != jnp.float32:                 # only cast non-f32 tables
        u = u.astype(jnp.float32)
    if v.dtype != jnp.float32:
        v = v.astype(jnp.float32)
    o_ref[...] = jnp.sum(u * v, axis=-1, keepdims=True)


@jax.jit
def matrix_factorization_forward(user_indices, item_indices,
                                 user_table, item_table):
    """Pallas implementation of MatrixFactorization.forward -> (B,) scores."""
    B = user_indices.shape[0]
    D = user_table.shape[1]
    u_bytes = jnp.dtype(user_table.dtype).itemsize
    i_bytes = jnp.dtype(item_table.dtype).itemsize

    TB, B_pad = _choose_tile(B, D, max(u_bytes, i_bytes))
    pad = B_pad - B

    # Pad the index vectors (with valid index 0), never the gathered slabs.
    if pad:
        user_indices = jnp.pad(user_indices, (0, pad))
        item_indices = jnp.pad(item_indices, (0, pad))

    # Row gather in the wrapper (XLA's dynamic gather).  Natural (B_pad, D)
    # row-major layout -> the kernel's input DMAs are contiguous row tiles.
    u_emb = jnp.take(user_table, user_indices, axis=0)     # (B_pad, D)
    i_emb = jnp.take(item_table, item_indices, axis=0)     # (B_pad, D)

    cost = pl.CostEstimate(
        flops=2 * B_pad * D,
        transcendentals=0,
        bytes_accessed=B_pad * D * (u_bytes + i_bytes) + B_pad * 4,
    )

    out = pl.pallas_call(
        _mf_score_kernel,
        out_shape=jax.ShapeDtypeStruct((B_pad, 1), jnp.float32),
        grid=(B_pad // TB,),
        in_specs=[
            pl.BlockSpec((TB, D), lambda b: (b, 0)),
            pl.BlockSpec((TB, D), lambda b: (b, 0)),
        ],
        out_specs=pl.BlockSpec((TB, 1), lambda b: (b, 0)),
        compiler_params=pltpu.CompilerParams(
            dimension_semantics=("parallel",),
        ),
        cost_estimate=cost,
    )(u_emb, i_emb)

    return out[:B, 0]                                        # (B,)


if __name__ == "__main__":
    num_users = 16
    num_items = 24
    embedding_dim = 32
    batch = 8

    key = jax.random.PRNGKey(0)
    k_u, k_i, k_ui, k_ii = jax.random.split(key, 4)

    # nn.Embedding default init: N(0, 1), float32.
    user_table = jax.random.normal(k_u, (num_users, embedding_dim), dtype=jnp.float32)
    item_table = jax.random.normal(k_i, (num_items, embedding_dim), dtype=jnp.float32)

    user_indices = jax.random.randint(k_ui, (batch,), 0, num_users, dtype=jnp.int32)
    item_indices = jax.random.randint(k_ii, (batch,), 0, num_items, dtype=jnp.int32)

    scores = matrix_factorization_forward(user_indices, item_indices,
                                          user_table, item_table)
    scores = jax.block_until_ready(scores)

    # Pure-JAX reference.
    ref = jnp.sum(user_table[user_indices] * item_table[item_indices], axis=1)
    assert scores.shape == (batch,)
    assert jnp.allclose(scores, ref, atol=1e-5, rtol=1e-5), (scores, ref)

    # Batch that is not a multiple of the lane width, large enough to take the
    # two-tile (megacore) path and the index-padding path.
    big_batch = 700
    k_bu, k_bi = jax.random.split(jax.random.PRNGKey(1))
    big_u = jax.random.randint(k_bu, (big_batch,), 0, num_users, dtype=jnp.int32)
    big_i = jax.random.randint(k_bi, (big_batch,), 0, num_items, dtype=jnp.int32)
    big_scores = jax.block_until_ready(
        matrix_factorization_forward(big_u, big_i, user_table, item_table))
    big_ref = jnp.sum(user_table[big_u] * item_table[big_i], axis=1)
    assert big_scores.shape == (big_batch,)
    assert jnp.allclose(big_scores, big_ref, atol=1e-5, rtol=1e-5)

    print("KERNEL_OK")
</pallas_src>

<mosaic_0001>
module attributes {stable_mosaic.version = 11 : i64} {
  func.func @_mf_score_kernel(%arg0: i32, %arg1: memref<128x32xf32, #tpu.memory_space<vmem>>, %arg2: memref<128x32xf32, #tpu.memory_space<vmem>>, %arg3: memref<128x1xf32, #tpu.memory_space<vmem>>) attributes {dimension_semantics = [#tpu.dimension_semantics<parallel>], iteration_bounds = array<i64: 1>, scalar_prefetch = 0 : i64, scratch_operands = 0 : i64, tpu.core_type = #tpu.core_type<tc>, window_params = [{transform_indices = @transform_0, window_bounds = array<i64: 128, 32>}, {transform_indices = @transform_1, window_bounds = array<i64: 128, 32>}, {transform_indices = @transform_2, window_bounds = array<i64: 128, 1>}]} {
    %c0 = arith.constant 0 : index
    %c0_0 = arith.constant 0 : index
    %0 = vector.load %arg1[%c0, %c0_0] : memref<128x32xf32, #tpu.memory_space<vmem>>, vector<128x32xf32>
    %c0_1 = arith.constant 0 : index
    %c0_2 = arith.constant 0 : index
    %1 = vector.load %arg2[%c0_1, %c0_2] : memref<128x32xf32, #tpu.memory_space<vmem>>, vector<128x32xf32>
    %2 = arith.mulf %0, %1 : vector<128x32xf32>
    %cst = arith.constant dense<0.000000e+00> : vector<128xf32>
    %3 = vector.multi_reduction <add>, %2, %cst [1] : vector<128x32xf32> to vector<128xf32>
    %4 = vector.shape_cast %3 : vector<128xf32> to vector<128x1xf32>
    %c0_3 = arith.constant 0 : index
    %c0_4 = arith.constant 0 : index
    %5 = vector.load %arg3[%c0_3, %c0_4] : memref<128x1xf32, #tpu.memory_space<vmem>>, vector<128x1xf32>
    tpu.vector_store %arg3[%c0_3, %c0_4], %4 {strides = array<i32>} : memref<128x1xf32, #tpu.memory_space<vmem>>, vector<128x1xf32>,
    return
  }
  func.func @transform_0(%arg0: i32) -> (i32, i32) {
    %c0_i32 = arith.constant 0 : i32
    %c0_i32_0 = arith.constant 0 : i32
    return %arg0, %c0_i32 : i32, i32
  }
  func.func @transform_1(%arg0: i32) -> (i32, i32) {
    %c0_i32 = arith.constant 0 : i32
    %c0_i32_0 = arith.constant 0 : i32
    return %arg0, %c0_i32 : i32, i32
  }
  func.func @transform_2(%arg0: i32) -> (i32, i32) {
    %c0_i32 = arith.constant 0 : i32
    %c0_i32_0 = arith.constant 0 : i32
    return %arg0, %c0_i32 : i32, i32
  }
}

</mosaic_0001>

<bundles_post_ra>
// kernel: matrix_factorization_forward.1
= control target key start
LH: loop header
LB: loop body
LE: loop exit
PB: predicated region body
PF: predicated region fallthrough
CT: control target
= control target key end

     0   :  { %vm59_vm0 = vcmask 261120   ;;  %vm108_vm1 = vcmask 7168   ;;  %s320_s0 = inlined_call_operand.vmem [shape: f32[128,32], index: 0, kind: input, shape index: {}]   ;;  %s321_s1 = inlined_call_operand.vmem [shape: f32[128,32], index: 1, kind: input, shape index: {}]   ;;  %s322_s2 = inlined_call_operand.vmem [shape: f32[128,1], index: 2, kind: output, shape index: {}]  }
   0x1   :  { %v13_v0 = vld [vmem:[%s320_s0 + $0x10] sm:$0xff]  ;;  %v11_v2 = vld [vmem:[%s320_s0] sm:$0xff]  ;;  %v14_v5 = vld [vmem:[%s320_s0 + $0x18] sm:$0xff] }
   0x2   :  { %v29_v1 = vld [vmem:[%s321_s1 + $0x10] sm:$0xff]  ;;  %v27_v4 = vld [vmem:[%s321_s1] sm:$0xff]  ;;  %v30_v6 = vld [vmem:[%s321_s1 + $0x18] sm:$0xff] }
   0x3   :  { %v45_v3 = vmul.f32 %v29_v1, %v13_v0  ;;  %v43_v7 = vmul.f32 %v27_v4, %v11_v2  ;;  %v46_v8 = vmul.f32 %v30_v6, %v14_v5  ;;  %v12_v9 = vld [vmem:[%s320_s0 + $0x8] sm:$0xff]  ;;  %v15_v15 = vld [vmem:[%s320_s0 + $0x20] sm:$0xff]  ;;  %v18_v22 = vld [vmem:[%s320_s0 + $0x38] sm:$0xff] }
   0x4   :  { %v28_v10 = vld [vmem:[%s321_s1 + $0x8] sm:$0xff]  ;;  %v31_v16 = vld [vmem:[%s321_s1 + $0x20] sm:$0xff]  ;;  %v34_v23 = vld [vmem:[%s321_s1 + $0x38] sm:$0xff] }
   0x5   :  { %v16_v11 = vld [vmem:[%s320_s0 + $0x28] sm:$0xff]  ;;  %v66_v12 = vsel %vm59_vm0, %v45_v3, 0.0  ;;  %v44_v13 = vmul.f32 %v28_v10, %v12_v9  ;;  %v60_v17 = vsel %vm59_vm0, %v43_v7, 0.0  ;;  %v69_v18 = vsel %vm59_vm0, %v46_v8, 0.0  ;;  %v17_v24 = vld [vmem:[%s320_s0 + $0x30] sm:$0xff]  ;;  %v19_v32 = vld [vmem:[%s320_s0 + $0x40] sm:$0xff] }
   0x6   :  { %v32_v14 = vld [vmem:[%s321_s1 + $0x28] sm:$0xff]  ;;  %67 = vadd.xlane.f32.xlu1 %v66_v12  ;;  %61 = vadd.xlane.f32.xlu0 %v60_v17  ;;  %v47_v21 = vmul.f32 %v31_v16, %v15_v15  ;;  %v33_v25 = vld [vmem:[%s321_s1 + $0x30] sm:$0xff]  ;;  %v50_v27 = vmul.f32 %v34_v23, %v18_v22  ;;  %v35_v33 = vld [vmem:[%s321_s1 + $0x40] sm:$0xff] }
   0x7   :  { %v48_v19 = vmul.f32 %v32_v14, %v16_v11  ;;  %v63_v20 = vsel %vm59_vm0, %v44_v13, 0.0  ;;  %v49_v29 = vmul.f32 %v33_v25, %v17_v24  ;;  %v20_v30 = vld [vmem:[%s320_s0 + $0x48] sm:$0xff]  ;;  %v51_v37 = vmul.f32 %v35_v33, %v19_v32  ;;  %v22_v38 = vld [vmem:[%s320_s0 + $0x58] sm:$0xff]  ;;  %v21_v40 = vld [vmem:[%s320_s0 + $0x50] sm:$0xff] }
   0x8   :  { %v72_v28 = vsel %vm59_vm0, %v47_v21, 0.0  ;;  %v36_v31 = vld [vmem:[%s321_s1 + $0x48] sm:$0xff]  ;;  %v81_v34 = vsel %vm59_vm0, %v50_v27, 0.0  ;;  %v38_v39 = vld [vmem:[%s321_s1 + $0x58] sm:$0xff]  ;;  %v37_v41 = vld [vmem:[%s321_s1 + $0x50] sm:$0xff] }
   0x9   :  { %v75_v26 = vsel %vm59_vm0, %v48_v19, 0.0  ;;  %v52_v35 = vmul.f32 %v36_v31, %v20_v30  ;;  %v78_v36 = vsel %vm59_vm0, %v49_v29, 0.0  ;;  %v54_v43 = vmul.f32 %v38_v39, %v22_v38  ;;  %v24_v46 = vld [vmem:[%s320_s0 + $0x68] sm:$0xff]  ;;  %v23_v48 = vld [vmem:[%s320_s0 + $0x60] sm:$0xff]  ;;  %v26_v54 = vld [vmem:[%s320_s0 + $0x78] sm:$0xff] }
   0xa   :  { %70 = vadd.xlane.f32.xlu1 %v69_v18  ;;  %64 = vadd.xlane.f32.xlu0 %v63_v20  ;;  %v84_v44 = vsel %vm59_vm0, %v51_v37, 0.0  ;;  %v53_v45 = vmul.f32 %v37_v41, %v21_v40  ;;  %v40_v47 = vld [vmem:[%s321_s1 + $0x68] sm:$0xff]  ;;  %v39_v49 = vld [vmem:[%s321_s1 + $0x60] sm:$0xff]  ;;  %v42_v55 = vld [vmem:[%s321_s1 + $0x78] sm:$0xff] }
   0xb   :  { %v87_v42 = vsel %vm59_vm0, %v52_v35, 0.0  ;;  %v93_v50 = vsel %vm59_vm0, %v54_v43, 0.0  ;;  %v56_v51 = vmul.f32 %v40_v47, %v24_v46  ;;  %v55_v53 = vmul.f32 %v39_v49, %v23_v48  ;;  %v25_v56 = vld [vmem:[%s320_s0 + $0x70] sm:$0xff] }
   0xc   :  { %v90_v52 = vsel %vm59_vm0, %v53_v45, 0.0  ;;  %v41_v57 = vld [vmem:[%s321_s1 + $0x70] sm:$0xff]  ;;  %v58_v59 = vmul.f32 %v42_v55, %v26_v54 }
   0xd   :  { %v99_v58 = vsel %vm59_vm0, %v56_v51, 0.0  ;;  %v96_v60 = vsel %vm59_vm0, %v55_v53, 0.0  ;;  %v57_v61 = vmul.f32 %v41_v57, %v25_v56 }
   0xe   :  { %76 = vadd.xlane.f32.xlu1 %v75_v26  ;;  %73 = vadd.xlane.f32.xlu0 %v72_v28  ;;  %v105_v62 = vsel %vm59_vm0, %v58_v59, 0.0 }
   0xf   :  { %v102_v63 = vsel %vm59_vm0, %v57_v61, 0.0 }
  0x12   :  { %82 = vadd.xlane.f32.xlu1 %v81_v34  ;;  %79 = vadd.xlane.f32.xlu0 %v78_v36 }
  0x16   :  { %88 = vadd.xlane.f32.xlu1 %v87_v42  ;;  %85 = vadd.xlane.f32.xlu0 %v84_v44 }
  0x1a   :  { %94 = vadd.xlane.f32.xlu1 %v93_v50  ;;  %91 = vadd.xlane.f32.xlu0 %v90_v52 }
  0x1e   :  { %100 = vadd.xlane.f32.xlu1 %v99_v58  ;;  %97 = vadd.xlane.f32.xlu0 %v96_v60 }
  0x22   :  { %106 = vadd.xlane.f32.xlu1 %v105_v62  ;;  %103 = vadd.xlane.f32.xlu0 %v102_v63 }
  0x93   :  { %v68_v0 = vpop.xlane.xlu1 %67  ;;  %v62_v1 = vpop.xlane.xlu0 %61 }
  0x94   :  { %111 = vst.msk [vmem:[%s322_s2 + $0x10] sm:$0xff] %vm108_vm1, %v68_v0  ;;  %109 = vst.msk [vmem:[%s322_s2] sm:$0xff] %vm108_vm1, %v62_v1 }
  0x97   :  { %v71_v2 = vpop.xlane.xlu1 %70  ;;  %v65_v3 = vpop.xlane.xlu0 %64 }
  0x98   :  { %112 = vst.msk [vmem:[%s322_s2 + $0x18] sm:$0xff] %vm108_vm1, %v71_v2  ;;  %110 = vst.msk [vmem:[%s322_s2 + $0x8] sm:$0xff] %vm108_vm1, %v65_v3 }
  0x9b   :  { %v77_v4 = vpop.xlane.xlu1 %76  ;;  %v74_v5 = vpop.xlane.xlu0 %73 }
  0x9c   :  { %114 = vst.msk [vmem:[%s322_s2 + $0x28] sm:$0xff] %vm108_vm1, %v77_v4  ;;  %113 = vst.msk [vmem:[%s322_s2 + $0x20] sm:$0xff] %vm108_vm1, %v74_v5 }
  0x9f   :  { %v83_v6 = vpop.xlane.xlu1 %82  ;;  %v80_v7 = vpop.xlane.xlu0 %79 }
  0xa0   :  { %116 = vst.msk [vmem:[%s322_s2 + $0x38] sm:$0xff] %vm108_vm1, %v83_v6  ;;  %115 = vst.msk [vmem:[%s322_s2 + $0x30] sm:$0xff] %vm108_vm1, %v80_v7 }
  0xa3   :  { %v89_v8 = vpop.xlane.xlu1 %88  ;;  %v86_v9 = vpop.xlane.xlu0 %85 }
  0xa4   :  { %118 = vst.msk [vmem:[%s322_s2 + $0x48] sm:$0xff] %vm108_vm1, %v89_v8  ;;  %117 = vst.msk [vmem:[%s322_s2 + $0x40] sm:$0xff] %vm108_vm1, %v86_v9 }
  0xa7   :  { %v95_v10 = vpop.xlane.xlu1 %94  ;;  %v92_v11 = vpop.xlane.xlu0 %91 }
  0xa8   :  { %120 = vst.msk [vmem:[%s322_s2 + $0x58] sm:$0xff] %vm108_vm1, %v95_v10  ;;  %119 = vst.msk [vmem:[%s322_s2 + $0x50] sm:$0xff] %vm108_vm1, %v92_v11 }
  0xab   :  { %v101_v12 = vpop.xlane.xlu1 %100  ;;  %v98_v13 = vpop.xlane.xlu0 %97 }
  0xac   :  { %122 = vst.msk [vmem:[%s322_s2 + $0x68] sm:$0xff] %vm108_vm1, %v101_v12  ;;  %121 = vst.msk [vmem:[%s322_s2 + $0x60] sm:$0xff] %vm108_vm1, %v98_v13 }
  0xaf   :  { %v107_v14 = vpop.xlane.xlu1 %106  ;;  %v104_v15 = vpop.xlane.xlu0 %103 }
  0xb0   :  { %124 = vst.msk [vmem:[%s322_s2 + $0x78] sm:$0xff] %vm108_vm1, %v107_v14  ;;  %123 = vst.msk [vmem:[%s322_s2 + $0x70] sm:$0xff] %vm108_vm1, %v104_v15 }

</bundles_post_ra>
